<compile_context>
chip_gen: v5e
topology: v5e:2x2
jax: 0.10.0
libtpu: 0.0.40
codegen_flags: <defaults>
</compile_context>

<pallas_src>
import math
import functools

import jax
import jax.numpy as jnp
from jax.experimental import pallas as pl
from jax.experimental.pallas import tpu as pltpu


# ----------------------------- tiling / VMEM config -----------------------------

def _vmem_limit_bytes():
    # Re-derive the scoped VMEM budget per chip (v5e/v6e: 128 MiB physical, v7x: 64 MiB).
    try:
        return int(pltpu.get_tpu_info().vmem_capacity_bytes * 3 // 4)
    except Exception:
        return 32 * 1024 * 1024


_VMEM_LIMIT = _vmem_limit_bytes()

# 512-tiles (128-multiples, so they also suit v5e's 4x128^2 MXU); measured mem-bound
# kernels reach ~85% of HBM roofline at 512 vs ~63% at 256.
_TM, _TN, _TK = 512, 512, 512


def _row_tile(m, target=_TM):
    """Row (sublane-major) tile: largest divisor <= target, else the full dim."""
    if m <= target:
        return m
    t = target
    while t >= 8:
        if m % t == 0:
            return t
        t //= 2
    return m


def _reduce_tile(k, target=_TK):
    """Reduction tile for dims we must not pad (e.g. d_model under a row-norm)."""
    if k <= target:
        return k
    t = target
    while t >= 128:
        if k % t == 0:
            return t
        t //= 2
    return k


def _lane_dim_and_tile(dim, target):
    """(padded_dim, tile) for a lane-major K/N dim of a big matmul.

    Guarantees the tile divides the (possibly zero-padded) dim, so the full-dim
    fallback can never produce a giant (tk, N) weight block (vocab_size=50257 etc.).
    """
    if dim <= target:
        return dim, dim
    t = target
    while t >= 128:
        if dim % t == 0:
            return dim, t
        t //= 2
    padded = -(-dim // target) * target
    return padded, target


# ----------------------------- tiled linear (bf16 MXU, f32 accumulate) -----------------------------

def _matmul_kernel(x_ref, w_ref, b_ref, o_ref, acc_ref, *, activation):
    """Tiled y = x @ w + b (optional ReLU); K-reduction over grid axis 2."""
    @pl.when(pl.program_id(2) == 0)
    def _():
        acc_ref[...] = jnp.zeros_like(acc_ref)

    acc_ref[...] += jnp.dot(
        x_ref[...].astype(jnp.bfloat16),
        w_ref[...].astype(jnp.bfloat16),
        preferred_element_type=jnp.float32,
    )

    @pl.when(pl.program_id(2) == pl.num_programs(2) - 1)
    def _():
        y = acc_ref[...] + b_ref[...]
        if activation == "relu":
            y = jnp.maximum(y, 0.0)
        o_ref[...] = y.astype(o_ref.dtype)


def pallas_linear(x, w, b, activation=None):
    """x: (M, K), w: (K, N), b: (N,) -> (M, N). Tiled, pipelined, megacore-parallel."""
    M, K = x.shape
    N = w.shape[1]
    tm = _row_tile(M)
    Kp, tk = _lane_dim_and_tile(K, _TK)
    Np, tn = _lane_dim_and_tile(N, _TN)
    # Zero-pad non-divisible large K/N (zeros contribute nothing to the dot product).
    xp = x if Kp == K else jnp.pad(x, ((0, 0), (0, Kp - K)))
    wp = w if (Kp == K and Np == N) else jnp.pad(w, ((0, Kp - K), (0, Np - N)))
    bp = b if Np == N else jnp.pad(b, (0, Np - N))
    grid = (M // tm, Np // tn, Kp // tk)
    out = pl.pallas_call(
        functools.partial(_matmul_kernel, activation=activation),
        out_shape=jax.ShapeDtypeStruct((M, Np), x.dtype),
        grid=grid,
        in_specs=[
            pl.BlockSpec((tm, tk), lambda i, j, k: (i, k)),
            pl.BlockSpec((tk, tn), lambda i, j, k: (k, j)),
            pl.BlockSpec((1, tn), lambda i, j, k: (0, j)),
        ],
        out_specs=pl.BlockSpec((tm, tn), lambda i, j, k: (i, j)),
        scratch_shapes=[pltpu.VMEM((tm, tn), jnp.float32)],
        compiler_params=pltpu.CompilerParams(
            dimension_semantics=("parallel", "parallel", "arbitrary"),
            vmem_limit_bytes=_VMEM_LIMIT,
        ),
    )(xp, wp, bp.reshape(1, Np))
    return out if Np == N else out[:, :N]


# ----------------------------- W_o matmul + residual + LayerNorm -----------------------------

def _linear_add_ln_kernel(x_ref, w_ref, b_ref, res_ref, g_ref, bt_ref, o_ref, acc_ref):
    """LayerNorm(res + x @ w + b) with the add+LN fused into the matmul epilogue."""
    @pl.when(pl.program_id(1) == 0)
    def _():
        acc_ref[...] = jnp.zeros_like(acc_ref)

    acc_ref[...] += jnp.dot(
        x_ref[...].astype(jnp.bfloat16),
        w_ref[...].astype(jnp.bfloat16),
        preferred_element_type=jnp.float32,
    )

    @pl.when(pl.program_id(1) == pl.num_programs(1) - 1)
    def _():
        h = acc_ref[...] + b_ref[...] + res_ref[...].astype(jnp.float32)
        mu = jnp.mean(h, axis=-1, keepdims=True)
        var = jnp.mean((h - mu) ** 2, axis=-1, keepdims=True)
        o_ref[...] = (
            (h - mu) * jax.lax.rsqrt(var + 1e-5) * g_ref[...] + bt_ref[...]
        ).astype(o_ref.dtype)


def pallas_linear_add_layernorm(x, w, b, res, gamma, beta):
    """LayerNorm(res + x @ w + b). N (= d_model) kept whole per tile for the row-norm."""
    M, K = x.shape
    N = w.shape[1]
    tm = _row_tile(M)
    tk = _reduce_tile(K)
    grid = (M // tm, K // tk)
    return pl.pallas_call(
        _linear_add_ln_kernel,
        out_shape=jax.ShapeDtypeStruct((M, N), x.dtype),
        grid=grid,
        in_specs=[
            pl.BlockSpec((tm, tk), lambda i, k: (i, k)),
            pl.BlockSpec((tk, N), lambda i, k: (k, 0)),
            pl.BlockSpec((1, N), lambda i, k: (0, 0)),
            pl.BlockSpec((tm, N), lambda i, k: (i, 0)),
            pl.BlockSpec((1, N), lambda i, k: (0, 0)),
            pl.BlockSpec((1, N), lambda i, k: (0, 0)),
        ],
        out_specs=pl.BlockSpec((tm, N), lambda i, k: (i, 0)),
        scratch_shapes=[pltpu.VMEM((tm, N), jnp.float32)],
        compiler_params=pltpu.CompilerParams(
            dimension_semantics=("parallel", "arbitrary"),
            vmem_limit_bytes=_VMEM_LIMIT,
        ),
    )(x, w, b.reshape(1, N), res, gamma.reshape(1, N), beta.reshape(1, N))


# ----------------------------- fused FFN + residual + LayerNorm -----------------------------

def _ffn_add_ln_kernel(x_ref, w1_ref, b1_ref, w2_ref, b2_ref, g_ref, bt_ref, o_ref):
    """LayerNorm(x + ReLU(x @ w1 + b1) @ w2 + b2); the (tm, d_ff) intermediate stays in VMEM."""
    x = x_ref[...].astype(jnp.float32)
    h = jnp.dot(x.astype(jnp.bfloat16), w1_ref[...].astype(jnp.bfloat16),
                preferred_element_type=jnp.float32) + b1_ref[...]
    h = jnp.maximum(h, 0.0)
    y = jnp.dot(h.astype(jnp.bfloat16), w2_ref[...].astype(jnp.bfloat16),
                preferred_element_type=jnp.float32) + b2_ref[...]
    r = x + y
    mu = jnp.mean(r, axis=-1, keepdims=True)
    var = jnp.mean((r - mu) ** 2, axis=-1, keepdims=True)
    o_ref[...] = (
        (r - mu) * jax.lax.rsqrt(var + 1e-5) * g_ref[...] + bt_ref[...]
    ).astype(o_ref.dtype)


def pallas_ffn_add_layernorm(x, w1, b1, w2, b2, gamma, beta):
    """Fused FFN + residual + LayerNorm; the (tm, d_ff) intermediate never hits HBM."""
    # TODO(synk): for production d_ff on v7x (64 MiB VMEM), tile over d_ff instead of
    #             keeping the full (D,F)+(F,D) weights resident.
    M, D = x.shape
    F = w1.shape[1]
    tm = _row_tile(M)
    grid = (M // tm,)
    return pl.pallas_call(
        _ffn_add_ln_kernel,
        out_shape=jax.ShapeDtypeStruct((M, D), x.dtype),
        grid=grid,
        in_specs=[
            pl.BlockSpec((tm, D), lambda i: (i, 0)),
            pl.BlockSpec((D, F), lambda i: (0, 0)),
            pl.BlockSpec((1, F), lambda i: (0, 0)),
            pl.BlockSpec((F, D), lambda i: (0, 0)),
            pl.BlockSpec((1, D), lambda i: (0, 0)),
            pl.BlockSpec((1, D), lambda i: (0, 0)),
            pl.BlockSpec((1, D), lambda i: (0, 0)),
        ],
        out_specs=pl.BlockSpec((tm, D), lambda i: (i, 0)),
        compiler_params=pltpu.CompilerParams(
            dimension_semantics=("parallel",),
            vmem_limit_bytes=_VMEM_LIMIT,
        ),
    )(x, w1, b1.reshape(1, F), w2, b2.reshape(1, D), gamma.reshape(1, D), beta.reshape(1, D))


# ----------------------------- final LayerNorm fused into vocab projection -----------------------------

def _ln_linear_kernel(x_ref, g_ref, bt_ref, w_ref, b_ref, o_ref):
    """y = LayerNorm(x) @ w + b; LN computed as the matmul prologue (full K per tile)."""
    h = x_ref[...].astype(jnp.float32)
    mu = jnp.mean(h, axis=-1, keepdims=True)
    var = jnp.mean((h - mu) ** 2, axis=-1, keepdims=True)
    xn = (h - mu) * jax.lax.rsqrt(var + 1e-5) * g_ref[...] + bt_ref[...]
    y = jnp.dot(xn.astype(jnp.bfloat16), w_ref[...].astype(jnp.bfloat16),
                preferred_element_type=jnp.float32) + b_ref[...]
    o_ref[...] = y.astype(o_ref.dtype)


def pallas_ln_linear(x, gamma, beta, w, b):
    """Fused final LayerNorm + output projection: removes one (B*S, d_model) HBM round trip."""
    # TODO(synk): for d_model larger than one K tile, split LN from the projection.
    M, K = x.shape
    N = w.shape[1]
    tm = _row_tile(M)
    Np, tn = _lane_dim_and_tile(N, _TN)     # pad odd vocab sizes to a tile multiple
    wp = w if Np == N else jnp.pad(w, ((0, 0), (0, Np - N)))
    bp = b if Np == N else jnp.pad(b, (0, Np - N))
    grid = (M // tm, Np // tn)
    out = pl.pallas_call(
        _ln_linear_kernel,
        out_shape=jax.ShapeDtypeStruct((M, Np), x.dtype),
        grid=grid,
        in_specs=[
            pl.BlockSpec((tm, K), lambda i, j: (i, 0)),
            pl.BlockSpec((1, K), lambda i, j: (0, 0)),
            pl.BlockSpec((1, K), lambda i, j: (0, 0)),
            pl.BlockSpec((K, tn), lambda i, j: (0, j)),
            pl.BlockSpec((1, tn), lambda i, j: (0, j)),
        ],
        out_specs=pl.BlockSpec((tm, tn), lambda i, j: (i, j)),
        compiler_params=pltpu.CompilerParams(
            dimension_semantics=("parallel", "parallel"),
            vmem_limit_bytes=_VMEM_LIMIT,
        ),
    )(x, gamma.reshape(1, K), beta.reshape(1, K), wp, bp.reshape(1, Np))
    return out if Np == N else out[:, :N]


# ----------------------------- sparse attention -----------------------------

def _sparse_attn_kernel(qkv_ref, o_ref, bias_ref, *, num_heads, d_model, d_k, scale,
                        block_size, sparsity_factor):
    """One batch per grid step; all heads processed via head-stacked batched matmuls.

    The sparse mask (local window + strided pattern) is built ONCE into a VMEM scratch
    as an additive 0 / -1e30 f32 bias (scratch persists across the sequential batch grid),
    so the O(S^2) iota/compare/select VPU work is not repeated per batch.
    """
    S = qkv_ref.shape[1]

    @pl.when(pl.program_id(0) == 0)
    def _():
        row = jax.lax.broadcasted_iota(jnp.int32, (S, S), 0)
        col = jax.lax.broadcasted_iota(jnp.int32, (S, S), 1)
        local = (col >= row - block_size // 2) & (col <= row + block_size // 2)
        strided = (col % sparsity_factor) == (row % sparsity_factor)
        bias_ref[...] = jnp.where(local | strided, 0.0, -1e30).astype(jnp.float32)

    qkv = qkv_ref[0]                                    # (S, 3*d_model) f32
    q = qkv[:, :d_model] * scale                        # fold 1/sqrt(d_k): one (S,D) multiply
    k = qkv[:, d_model:2 * d_model]
    v = qkv[:, 2 * d_model:]

    def to_heads(t):                                    # (S, D) -> (H, S, d_k), bf16 for the MXU
        return jnp.stack(
            [t[:, h * d_k:(h + 1) * d_k] for h in range(num_heads)], axis=0
        ).astype(jnp.bfloat16)

    qh, kh, vh = to_heads(q), to_heads(k), to_heads(v)

    # head-stacked batched matmuls: bf16 operands, f32 accumulation / softmax.
    s = jnp.einsum("hqd,hkd->hqk", qh, kh, preferred_element_type=jnp.float32)
    s = s + bias_ref[...][None, :, :]
    m = jnp.max(s, axis=-1, keepdims=True)
    p = jnp.exp(s - m)
    p = p / jnp.sum(p, axis=-1, keepdims=True)          # exact softmax (no approx reciprocal)
    o = jnp.einsum("hqk,hkd->hqd", p.astype(jnp.bfloat16), vh,
                   preferred_element_type=jnp.float32)  # (H, S, d_k)

    # single lane-dense (S, d_model) store
    # TODO(synk): with flash tiling and d_k >= 128 this repack becomes a free reshape.
    o_ref[0] = jnp.concatenate([o[h] for h in range(num_heads)], axis=-1).astype(o_ref.dtype)


def pallas_sparse_attention(qkv, *, num_heads, d_model, scale, block_size, sparsity_factor):
    """qkv: (B, S, 3*d_model) fused projections -> (B, S, d_model) attention output."""
    B, S, threeD = qkv.shape
    d_k = d_model // num_heads
    return pl.pallas_call(
        functools.partial(
            _sparse_attn_kernel,
            num_heads=num_heads, d_model=d_model, d_k=d_k, scale=scale,
            block_size=block_size, sparsity_factor=sparsity_factor,
        ),
        out_shape=jax.ShapeDtypeStruct((B, S, d_model), qkv.dtype),
        grid=(B,),
        in_specs=[pl.BlockSpec((1, S, threeD), lambda b: (b, 0, 0))],
        out_specs=pl.BlockSpec((1, S, d_model), lambda b: (b, 0, 0)),
        scratch_shapes=[pltpu.VMEM((S, S), jnp.float32)],
        compiler_params=pltpu.CompilerParams(
            # "arbitrary": the bias scratch is built at step 0 and reused sequentially.
            dimension_semantics=("arbitrary",),
            vmem_limit_bytes=_VMEM_LIMIT,
        ),
    )(qkv)


# ----------------------------- model glue (plain JAX) -----------------------------

def create_sparse_mask(seq_length, block_size, sparsity_factor):
    """Local window +/- block_size//2 plus strided pattern (same as torch reference)."""
    i = jnp.arange(seq_length)[:, None]
    j = jnp.arange(seq_length)[None, :]
    local = (j >= i - block_size // 2) & (j <= i + block_size // 2)
    strided = (j % sparsity_factor) == (i % sparsity_factor)
    return local | strided


def _init_linear(key, d_in, d_out):
    # torch.nn.Linear default init: U(-1/sqrt(fan_in), 1/sqrt(fan_in))
    kw, kb = jax.random.split(key)
    bound = 1.0 / math.sqrt(d_in)
    w = jax.random.uniform(kw, (d_in, d_out), jnp.float32, -bound, bound)
    b = jax.random.uniform(kb, (d_out,), jnp.float32, -bound, bound)
    return w, b


def init_params(key, d_model, num_heads, num_layers, d_ff, max_seq_length, vocab_size):
    keys = jax.random.split(key, 3 + num_layers)
    params = {
        "tok_emb": 0.02 * jax.random.normal(keys[0], (vocab_size, d_model), jnp.float32),
        "pos_emb": 0.02 * jax.random.normal(keys[1], (max_seq_length, d_model), jnp.float32),
        "blocks": [],
        "lnf_g": jnp.ones((d_model,), jnp.float32),
        "lnf_b": jnp.zeros((d_model,), jnp.float32),
    }
    for l in range(num_layers):
        ks = jax.random.split(keys[2 + l], 6)
        wq = _init_linear(ks[0], d_model, d_model)
        wk = _init_linear(ks[1], d_model, d_model)
        wv = _init_linear(ks[2], d_model, d_model)
        params["blocks"].append(
            {
                # fused QKV projection weights
                "w_qkv": jnp.concatenate([wq[0], wk[0], wv[0]], axis=1),
                "b_qkv": jnp.concatenate([wq[1], wk[1], wv[1]]),
                "wo": _init_linear(ks[3], d_model, d_model),
                "ff1": _init_linear(ks[4], d_model, d_ff),
                "ff2": _init_linear(ks[5], d_ff, d_model),
                "ln1_g": jnp.ones((d_model,), jnp.float32),
                "ln1_b": jnp.zeros((d_model,), jnp.float32),
                "ln2_g": jnp.ones((d_model,), jnp.float32),
                "ln2_b": jnp.zeros((d_model,), jnp.float32),
            }
        )
    params["out_proj"] = _init_linear(keys[2 + num_layers], d_model, vocab_size)
    return params


def sparse_transformer_forward(params, input_ids, *, num_heads, block_size, sparsity_factor):
    B, S = input_ids.shape
    d_model = params["tok_emb"].shape[1]
    d_k = d_model // num_heads
    scale = 1.0 / math.sqrt(d_k)

    # embeddings (gather is glue, kept in plain JAX)
    positions = jnp.arange(S)
    x = params["tok_emb"][input_ids] + params["pos_emb"][positions][None, :, :]
    x2 = x.reshape(B * S, d_model)

    for blk in params["blocks"]:
        # --- sparse attention sub-layer ---
        qkv = pallas_linear(x2, blk["w_qkv"], blk["b_qkv"])            # (B*S, 3*d_model)
        attn = pallas_sparse_attention(
            qkv.reshape(B, S, 3 * d_model),
            num_heads=num_heads, d_model=d_model, scale=scale,
            block_size=block_size, sparsity_factor=sparsity_factor,
        ).reshape(B * S, d_model)
        # W_o matmul fused with residual-add + LayerNorm1
        x2 = pallas_linear_add_layernorm(attn, blk["wo"][0], blk["wo"][1],
                                         x2, blk["ln1_g"], blk["ln1_b"])
        # --- feed-forward sub-layer (ff1+ReLU+ff2+residual+LN fused) ---
        x2 = pallas_ffn_add_layernorm(x2, blk["ff1"][0], blk["ff1"][1],
                                      blk["ff2"][0], blk["ff2"][1],
                                      blk["ln2_g"], blk["ln2_b"])

    # final LayerNorm fused into the vocab projection
    logits = pallas_ln_linear(x2, params["lnf_g"], params["lnf_b"], *params["out_proj"])
    return logits.reshape(B, S, -1)


# ----------------------------- pure-JAX reference (bf16-MXU-matched) -----------------------------

def _bdot(a, b):
    """Matmul with bf16 operands / f32 accumulation, mirroring the kernels' MXU usage."""
    return jnp.dot(a.astype(jnp.bfloat16), b.astype(jnp.bfloat16),
                   preferred_element_type=jnp.float32)


def _beinsum(eq, a, b):
    return jnp.einsum(eq, a.astype(jnp.bfloat16), b.astype(jnp.bfloat16),
                      preferred_element_type=jnp.float32)


def reference_forward(params, input_ids, *, num_heads, block_size, sparsity_factor):
    """Same math as the PyTorch module, with matmul operands in bf16 (f32 accumulate /
    f32 softmax / f32 LayerNorm) to mirror the kernel's MXU precision choice."""
    B, S = input_ids.shape
    d_model = params["tok_emb"].shape[1]
    d_k = d_model // num_heads
    scale = 1.0 / math.sqrt(d_k)

    def layernorm(h, g, b):
        mu = jnp.mean(h, -1, keepdims=True)
        var = jnp.mean((h - mu) ** 2, -1, keepdims=True)
        return (h - mu) * jax.lax.rsqrt(var + 1e-5) * g + b

    x = params["tok_emb"][input_ids] + params["pos_emb"][jnp.arange(S)][None, :, :]
    mask = create_sparse_mask(S, block_size, sparsity_factor)
    bias = jnp.where(mask, 0.0, -1e30).astype(jnp.float32)

    for blk in params["blocks"]:
        qkv = _bdot(x.reshape(B * S, d_model), blk["w_qkv"]).reshape(B, S, -1) + blk["b_qkv"]
        q, k, v = jnp.split(qkv, 3, axis=-1)
        q = q * scale

        def heads(t):
            return t.reshape(B, S, num_heads, d_k).transpose(0, 2, 1, 3)

        qh, kh, vh = heads(q), heads(k), heads(v)
        s = _beinsum("bhqd,bhkd->bhqk", qh, kh) + bias[None, None]
        m = jnp.max(s, axis=-1, keepdims=True)
        p = jnp.exp(s - m)
        p = p / jnp.sum(p, axis=-1, keepdims=True)
        o = _beinsum("bhqk,bhkd->bhqd", p, vh)
        o = o.transpose(0, 2, 1, 3).reshape(B, S, d_model)
        attn = _bdot(o.reshape(B * S, d_model), blk["wo"][0]).reshape(B, S, d_model) + blk["wo"][1]
        x = layernorm(x + attn, blk["ln1_g"], blk["ln1_b"])
        h1 = jnp.maximum(_bdot(x.reshape(B * S, d_model), blk["ff1"][0]) + blk["ff1"][1], 0.0)
        ff = _bdot(h1, blk["ff2"][0]).reshape(B, S, d_model) + blk["ff2"][1]
        x = layernorm(x + ff, blk["ln2_g"], blk["ln2_b"])

    xn = layernorm(x, params["lnf_g"], params["lnf_b"])
    logits = _bdot(xn.reshape(B * S, d_model), params["out_proj"][0]) + params["out_proj"][1]
    return logits.reshape(B, S, -1)


# ----------------------------- main -----------------------------

if __name__ == "__main__":
    d_model, num_heads, num_layers, d_ff = 32, 4, 2, 64
    max_seq_length, vocab_size = 16, 64
    block_size, sparsity_factor = 4, 4
    B, S = 2, 8

    key = jax.random.PRNGKey(0)
    pkey, dkey = jax.random.split(key)
    params = init_params(pkey, d_model, num_heads, num_layers, d_ff, max_seq_length, vocab_size)
    input_ids = jax.random.randint(dkey, (B, S), 0, vocab_size, dtype=jnp.int32)

    logits = sparse_transformer_forward(
        params, input_ids,
        num_heads=num_heads, block_size=block_size, sparsity_factor=sparsity_factor,
    )
    jax.block_until_ready(logits)

    assert logits.shape == (B, S, vocab_size)
    assert bool(jnp.all(jnp.isfinite(logits)))

    ref = reference_forward(
        params, input_ids,
        num_heads=num_heads, block_size=block_size, sparsity_factor=sparsity_factor,
    )
    max_err = float(jnp.max(jnp.abs(logits - ref)))
    # Reference mirrors the kernel's bf16-operand / f32-accumulate matmuls, so remaining
    # differences are only accumulation-order noise; pure-f32 torch numerics differ by
    # the (accepted) bf16 quantization of the MXU operands.
    assert max_err < 2e-2, f"max abs error vs reference: {max_err}"

    print("KERNEL_OK")
</pallas_src>

<mosaic_0001>
module attributes {stable_mosaic.version = 11 : i64} {
  func.func @_matmul_kernel(%arg0: i32, %arg1: i32, %arg2: i32, %arg3: memref<16x32xf32, #tpu.memory_space<vmem>>, %arg4: memref<32x96xf32, #tpu.memory_space<vmem>>, %arg5: memref<1x96xf32, #tpu.memory_space<vmem>>, %arg6: memref<16x96xf32, #tpu.memory_space<vmem>>, %arg7: memref<16x96xf32, #tpu.memory_space<vmem>>) attributes {dimension_semantics = [#tpu.dimension_semantics<parallel>, #tpu.dimension_semantics<parallel>, #tpu.dimension_semantics<arbitrary>], iteration_bounds = array<i64: 1, 1, 1>, scalar_prefetch = 0 : i64, scratch_operands = 1 : i64, tpu.core_type = #tpu.core_type<tc>, window_params = [{transform_indices = @transform_0, window_bounds = array<i64: 16, 32>}, {transform_indices = @transform_1, window_bounds = array<i64: 32, 96>}, {transform_indices = @transform_2, window_bounds = array<i64: 1, 96>}, {transform_indices = @transform_3, window_bounds = array<i64: 16, 96>}]} {
    %c0_i32 = arith.constant 0 : i32
    %0 = arith.cmpi eq, %arg2, %c0_i32 : i32
    %1 = arith.extui %0 : i1 to i32
    %c0_i32_0 = arith.constant 0 : i32
    %2 = arith.cmpi ne, %1, %c0_i32_0 : i32
    scf.if %2 {
      %cst_10 = arith.constant 0.000000e+00 : f32
      %14 = vector.broadcast %cst_10 : f32 to vector<16x96xf32>
      %c0_11 = arith.constant 0 : index
      %c0_12 = arith.constant 0 : index
      %15 = vector.load %arg7[%c0_11, %c0_12] : memref<16x96xf32, #tpu.memory_space<vmem>>, vector<16x96xf32>
      tpu.vector_store %arg7[%c0_11, %c0_12], %14 {strides = array<i32>} : memref<16x96xf32, #tpu.memory_space<vmem>>, vector<16x96xf32>,
    } else {
    }
    %c0 = arith.constant 0 : index
    %c0_1 = arith.constant 0 : index
    %3 = vector.load %arg7[%c0, %c0_1] : memref<16x96xf32, #tpu.memory_space<vmem>>, vector<16x96xf32>
    %c0_2 = arith.constant 0 : index
    %c0_3 = arith.constant 0 : index
    %4 = vector.load %arg3[%c0_2, %c0_3] : memref<16x32xf32, #tpu.memory_space<vmem>>, vector<16x32xf32>
    %5 = arith.truncf %4 : vector<16x32xf32> to vector<16x32xbf16>
    %c0_4 = arith.constant 0 : index
    %c0_5 = arith.constant 0 : index
    %6 = vector.load %arg4[%c0_4, %c0_5] : memref<32x96xf32, #tpu.memory_space<vmem>>, vector<32x96xf32>
    %7 = arith.truncf %6 : vector<32x96xf32> to vector<32x96xbf16>
    %cst = arith.constant dense<0.000000e+00> : vector<16x96xf32>
    %8 = tpu.matmul %5, %7, %cst {dimension_numbers = #tpu.dot_dimension_numbers<[1], [0], [0], [1], [0, 0, 1, 1], [], []>} : vector<16x32xbf16>, vector<32x96xbf16>, vector<16x96xf32> -> vector<16x96xf32>
    %9 = arith.addf %3, %8 : vector<16x96xf32>
    %c0_6 = arith.constant 0 : index
    %c0_7 = arith.constant 0 : index
    %10 = vector.load %arg7[%c0_6, %c0_7] : memref<16x96xf32, #tpu.memory_space<vmem>>, vector<16x96xf32>
    tpu.vector_store %arg7[%c0_6, %c0_7], %9 {strides = array<i32>} : memref<16x96xf32, #tpu.memory_space<vmem>>, vector<16x96xf32>,
    %c0_i32_8 = arith.constant 0 : i32
    %11 = arith.cmpi eq, %arg2, %c0_i32_8 : i32
    %12 = arith.extui %11 : i1 to i32
    %c0_i32_9 = arith.constant 0 : i32
    %13 = arith.cmpi ne, %12, %c0_i32_9 : i32
    scf.if %13 {
      %c0_10 = arith.constant 0 : index
      %c0_11 = arith.constant 0 : index
      %14 = vector.load %arg7[%c0_10, %c0_11] : memref<16x96xf32, #tpu.memory_space<vmem>>, vector<16x96xf32>
      %c0_12 = arith.constant 0 : index
      %c0_13 = arith.constant 0 : index
      %15 = vector.load %arg5[%c0_12, %c0_13] : memref<1x96xf32, #tpu.memory_space<vmem>>, vector<1x96xf32>
      %16 = vector.broadcast %15 : vector<1x96xf32> to vector<16x96xf32>
      %17 = arith.addf %14, %16 : vector<16x96xf32>
      %c0_14 = arith.constant 0 : index
      %c0_15 = arith.constant 0 : index
      %18 = vector.load %arg6[%c0_14, %c0_15] : memref<16x96xf32, #tpu.memory_space<vmem>>, vector<16x96xf32>
      tpu.vector_store %arg6[%c0_14, %c0_15], %17 {strides = array<i32>} : memref<16x96xf32, #tpu.memory_space<vmem>>, vector<16x96xf32>,
    } else {
    }
    return
  }
  func.func @transform_0(%arg0: i32, %arg1: i32, %arg2: i32) -> (i32, i32) {
    %c0_i32 = arith.constant 0 : i32
    return %arg0, %arg2 : i32, i32
  }
  func.func @transform_1(%arg0: i32, %arg1: i32, %arg2: i32) -> (i32, i32) {
    %c0_i32 = arith.constant 0 : i32
    return %arg2, %arg1 : i32, i32
  }
  func.func @transform_2(%arg0: i32, %arg1: i32, %arg2: i32) -> (i32, i32) {
    %c0_i32 = arith.constant 0 : i32
    %c0_i32_0 = arith.constant 0 : i32
    return %c0_i32, %arg1 : i32, i32
  }
  func.func @transform_3(%arg0: i32, %arg1: i32, %arg2: i32) -> (i32, i32) {
    %c0_i32 = arith.constant 0 : i32
    return %arg0, %arg1 : i32, i32
  }
}

</mosaic_0001>

<bundles_post_ra>
// kernel: tpu_custom_call.1
= control target key start
LH: loop header
LB: loop body
LE: loop exit
PB: predicated region body
PF: predicated region fallthrough
CT: control target
= control target key end

     0   :  { %8 = vsyncpa [#allocation4], 0  ;;  %s261_s0 = inlined_call_operand.hbm [shape: f32[16,32], index: 0, kind: input, shape index: {}]   ;;  %s262_s1 = inlined_call_operand.hbm [shape: f32[32,96], index: 1, kind: input, shape index: {}]   ;;  %s263_s2 = inlined_call_operand.vmem [shape: f32[1,96], index: 2, kind: input, shape index: {}]   ;;  %s264_s3 = inlined_call_operand.hbm [shape: f32[16,96], index: 3, kind: output, shape index: {}]  }
   0x1   :  { %9 = vsyncpa [#allocation7], 0 }
   0x2   :  { %10 = vsyncpa [#allocation5], 0  ;;  %s15_s14 = sshll.u32 %s261_s0, 4  ;;  %s208_s15 = smov [#allocation3]   ;;  %s16_s14 = int_to_ptr.hbm [resolvable:$true] %s15_s14 }
   0x3   :  { %s17_s16 = sshll.u32 %s208_s15, 4  ;;  %s28_s19 = sshll.u32 %s262_s1, 4  ;;  %s18_s16 = int_to_ptr.vmem [resolvable:$true] %s17_s16  ;;  %s29_s19 = int_to_ptr.hbm [resolvable:$true] %s28_s19 }
   0x4   :  { %s209_s20 = smov 128   ;;  %s210_s21 = smov 8  }
   0x5   :  { %23 = dma.hbm_to_vmem [thread:$0]  %s16_s14, 256, %s18_s16, [#allocation4], %s209_s20, %s209_s20, %s210_s21  }
   0x6   :  { %s211_s22 = smov [#allocation6]  }
   0x7   :  { %s30_s23 = sshll.u32 %s211_s22, 4  ;;  %s31_s23 = int_to_ptr.vmem [resolvable:$true] %s30_s23 }
   0x8   :  { %36 = dma.hbm_to_vmem [thread:$0]  %s29_s19, 512, %s31_s23, [#allocation7], %s209_s20, %s209_s20, %s210_s21  }
   0x9   :  { %202 = dma.done.wait [#allocation4], 256  }
   0xa   :  { %203 = vsyncadd [#allocation4], 4294967040 }
   0xb   :  { %204 = dma.done.wait [#allocation7], 512  }
   0xc   :  { %205 = vsyncadd [#allocation7], 4294966784  ;;  %vm52_vm0 = vcmask 785408   ;;  %v212_v0 = vmov 0.0   ;;  %v62_v1 = vld [vmem:[#allocation6 + $0x10] sm:$0xff]  ;;  %v63_v2 = vld [vmem:[#allocation6 + $0x18] sm:$0xff] }
   0xd   :  { %53 = vst.msk [vmem:[#allocation2] sm:$0xff] %vm52_vm0, %v212_v0  ;;  %v60_v3 = vld [vmem:[#allocation6] sm:$0xff]  ;;  %v65_v4 = vpack.c.bf16 %v63_v2, %v62_v1  ;;  %v61_v5 = vld [vmem:[#allocation6 + $0x8] sm:$0xff]  ;;  %v57_v7 = vld [vmem:[#allocation3] sm:$0xff]  ;;  %vm66_vm1 = vcmask 261120   ;;  %s213_s24 = smov [#allocation8]  }
   0xe   :  { %54 = vst.msk [vmem:[#allocation2 + $0x8] sm:$0xff] %vm52_vm0, %v212_v0  ;;  %v64_v6 = vpack.c.bf16 %v61_v5, %v60_v3  ;;  %v58_v8 = vld [vmem:[#allocation3 + $0x8] sm:$0xff]  ;;  %v129_v14 = vld [vmem:[%s263_s2] ss:$0 sm:$0xff]  ;;  %s106_s25 = sshll.u32 %s213_s24, 4  ;;  %s108_s28 = sshll.u32 %s264_s3, 4  ;;  %s107_s25 = int_to_ptr.vmem [resolvable:$true] %s106_s25  ;;  %s109_s28 = int_to_ptr.hbm [resolvable:$true] %s108_s28 }
   0xf   :  { %76 = vmatpush.bf16.msra.mxu0 %v65_v4  ;;  %v59_v9 = vpack.c.bf16 %v58_v8, %v57_v7 }
  0x13   :  { %77 = vmatpush.bf16.msra.mxu0 %v64_v6 }
  0x14   :  { %v55_v10 = vld [vmem:[#allocation2] sm:$0xff] }
  0x15   :  { %v56_v13 = vld [vmem:[#allocation2 + $0x8] sm:$0xff] }
  0x16   :  { %122 = vmatmul.msk.bf16.vlgmr.msra.gmra.mxu0 %vm66_vm1, %v59_v9 }
  0x93   :  { %v79_v11 = vpop.f32.mrf.mxu0 }
  0x94   :  { %v84_v12 = vadd.f32 %v79_v11, %v55_v10 }
  0x96   :  { %87 = vst.msk [vmem:[#allocation2] sm:$0xff] %vm52_vm0, %v84_v12 }
  0x9b   :  { %v81_v15 = vpop.f32.mrf.mxu0 }
  0x9c   :  { %v85_v16 = vadd.f32 %v81_v15, %v56_v13 }
  0x9d   :  { %v92_v17 = vld [vmem:[#allocation2] sm:$0xff] }
  0x9e   :  { %88 = vst.msk [vmem:[#allocation2 + $0x8] sm:$0xff] %vm52_vm0, %v85_v16  ;;  %v98_v18 = vadd.f32 %v129_v14, %v92_v17 }
  0xa0   :  { %100 = vst.msk [vmem:[#allocation8] sm:$0xff] %vm52_vm0, %v98_v18 }
  0xa5   :  { %v93_v19 = vld [vmem:[#allocation2 + $0x8] sm:$0xff] }
  0xa6   :  { %v99_v20 = vadd.f32 %v129_v14, %v93_v19 }
  0xa8   :  { %101 = vst.msk [vmem:[#allocation8 + $0x8] sm:$0xff] %vm52_vm0, %v99_v20 }
  0xa9   :  { %114 = dma.vmem_to_hbm [thread:$0]  %s107_s25, 256, %s109_s28, [#allocation5], %s209_s20, %s209_s20, %s210_s21  }
  0xaa   :  { %206 = dma.done.wait [#allocation5], 256  }
  0xab   :  { %207 = vsyncadd [#allocation5], 4294967040 }
  0xac   :  { %119 = vsyncpa [#allocation4], 1 }
  0xad   :  { %120 = vsyncpa [#allocation7], 1 }
  0xae   :  { %121 = vsyncpa [#allocation5], 1 }

</bundles_post_ra>
